<compile_context>
chip_gen: v7x
topology: tpu7x:2x2x1
jax: 0.10.0
libtpu: 0.0.40
codegen_flags: <defaults>
</compile_context>

<pallas_src>
import jax
import jax.numpy as jnp
import numpy as np
from jax.experimental import pallas as pl
from jax.experimental.pallas import tpu as pltpu

# ----- model config (small synthetic shapes consistent with the module) -----
VOCAB = 50
EMBED = 32            # embedding_matrix.shape[1]
SEQ = 16              # sequence length
N_FILTERS = 128
KERNEL_SIZES = (1, 3, 5)
N_CLASSES = 2
BATCH = 2
TOTAL_TAPS = sum(KERNEL_SIZES)                 # 9
WBIG_COLS = TOTAL_TAPS * N_FILTERS             # 1152


def textcnn_kernel(tok_ref, embm_ref, wbig_ref, cbias_ref, wfc_ref, bfc_ref,
                   out_ref):
    B = out_ref.shape[0]
    BL = tok_ref.shape[0]
    L = BL // B
    F = N_FILTERS

    # --- fused embedding lookup: one-hot @ embedding matrix on the MXU ------
    tok = tok_ref[...]                                        # (B*L, 1) int32
    iota = jax.lax.broadcasted_iota(jnp.int32, (BL, VOCAB), 1)
    onehot = (iota == tok).astype(jnp.bfloat16)               # (B*L, VOCAB)
    emb = jnp.dot(onehot, embm_ref[...],                      # bf16 x bf16
                  preferred_element_type=jnp.float32)         # (B*L, E) f32
    emb_bf = emb.astype(jnp.bfloat16)                         # exact round-trip

    # --- all conv taps in a single lane-dense matmul -------------------------
    big = jnp.dot(emb_bf, wbig_ref[...],                      # (B*L, 1152) f32
                  preferred_element_type=jnp.float32)
    big = big.reshape(B, L, WBIG_COLS)

    cbias = cbias_ref[...]                                    # (n_branch, F)
    wfc = wfc_ref[...]                                        # (3F, 2)

    logits = jnp.zeros((B, N_CLASSES), jnp.float32)
    col = 0
    for br, K in enumerate(KERNEL_SIZES):                     # static unroll
        L_out = L - K + 1
        # conv_out[:, t, :] = sum_k big[:, t + k, tap(k)]  (shift-and-add, VPU)
        acc = big[:, 0:L_out, col:col + F]
        for k in range(1, K):
            acc = acc + big[:, k:k + L_out, col + k * F:col + (k + 1) * F]
        # Bias + ReLU AFTER the time max-pool:
        #   max_t relu(x_t + b) == relu(max_t x_t + b)
        # (both monotone, bias time-invariant — documented assumption).
        pooled = jnp.max(acc, axis=1)                         # (B, F)
        act = jnp.maximum(pooled + cbias[br:br + 1, :], 0.0)  # (B, F) f32
        # Per-branch FC partial sum — avoids a lane-axis concatenate.
        logits = logits + jnp.dot(act, wfc[br * F:(br + 1) * F, :],
                                  preferred_element_type=jnp.float32)
        col += K * F

    # Dropout is identity at inference time.
    # TODO(synk): training-mode dropout (pltpu.prng_seed + prng_random_bits)
    # not implemented.
    out_ref[...] = logits + bfc_ref[...]                      # (B, 2) + (1, 2)


def textcnn_forward(token_ids, emb_matrix, conv_ws, conv_bs, wfc, bfc):
    B, L = token_ids.shape
    tok2d = token_ids.reshape(B * L, 1).astype(jnp.int32)
    embm_bf = emb_matrix.astype(jnp.bfloat16)                 # (VOCAB, E)
    # All conv taps concatenated along the filter axis -> (E, 1152), bf16.
    w_big = jnp.concatenate(
        [conv_ws[i][k] for i, K in enumerate(KERNEL_SIZES) for k in range(K)],
        axis=1).astype(jnp.bfloat16)
    cbias = jnp.concatenate(conv_bs, axis=0)                  # (3, F) f32

    args = (tok2d, embm_bf, w_big, cbias, wfc, bfc)
    vmem = pl.BlockSpec(memory_space=pltpu.MemorySpace.VMEM)

    flops = (2 * B * L * VOCAB * EMBED                        # one-hot gather
             + 2 * B * L * EMBED * WBIG_COLS                  # fused conv
             + 2 * B * len(KERNEL_SIZES) * N_FILTERS * N_CLASSES)
    bytes_accessed = (sum(int(np.prod(a.shape)) * a.dtype.itemsize for a in args)
                      + B * N_CLASSES * 4)

    # TODO(synk): for non-toy batch sizes, add a batch-tiled grid with
    # dimension_semantics=("parallel",) (needed to occupy both v7x TCs) and
    # re-derive tile sizes against v7x's 64 MiB VMEM.
    return pl.pallas_call(
        textcnn_kernel,
        out_shape=jax.ShapeDtypeStruct((B, N_CLASSES), jnp.float32),
        in_specs=[vmem] * len(args),
        out_specs=vmem,
        cost_estimate=pl.CostEstimate(flops=flops, transcendentals=0,
                                      bytes_accessed=bytes_accessed),
    )(*args)


def textcnn_reference(token_ids, emb_matrix, conv_ws, conv_bs, wfc, bfc):
    # Pure-JAX reference in the original PyTorch op order (conv -> +bias ->
    # ReLU -> max-pool -> concat -> fc).  Matmul inputs are cast to bf16 with
    # f32 accumulation to match the kernel's MXU precision choice.
    emb = emb_matrix.astype(jnp.bfloat16)[token_ids]          # (B, L, E) bf16
    L = emb.shape[1]
    pools = []
    for K, w, b in zip(KERNEL_SIZES, conv_ws, conv_bs):
        L_out = L - K + 1
        w_bf = w.astype(jnp.bfloat16)
        acc = sum(jax.lax.dot_general(emb[:, k:k + L_out, :], w_bf[k],
                                      (((2,), (0,)), ((), ())),
                                      preferred_element_type=jnp.float32)
                  for k in range(K))
        acc = acc + b[None, :, :]                             # (B, L_out, F)
        acc = jnp.maximum(acc, 0.0)
        pools.append(jnp.max(acc, axis=1))                    # (B, F)
    cat = jnp.concatenate(pools, axis=1)                      # (B, 3F)
    return cat @ wfc + bfc


if __name__ == "__main__":
    key = jax.random.PRNGKey(0)
    k_emb, k_tok, k_fc, kb_fc, *k_convs = jax.random.split(
        key, 4 + 2 * len(KERNEL_SIZES))

    emb_matrix = jax.random.normal(k_emb, (VOCAB, EMBED), jnp.float32) * 0.1
    token_ids = jax.random.randint(k_tok, (BATCH, SEQ), 0, VOCAB)

    conv_ws, conv_bs = [], []
    for i, K in enumerate(KERNEL_SIZES):
        conv_ws.append(jax.random.normal(k_convs[2 * i], (K, EMBED, N_FILTERS),
                                         jnp.float32) * 0.05)
        conv_bs.append(jax.random.normal(k_convs[2 * i + 1], (1, N_FILTERS),
                                         jnp.float32) * 0.05)

    wfc = jax.random.normal(k_fc, (N_FILTERS * len(KERNEL_SIZES), N_CLASSES),
                            jnp.float32) * 0.05
    bfc = jax.random.normal(kb_fc, (1, N_CLASSES), jnp.float32) * 0.05

    out = textcnn_forward(token_ids, emb_matrix, conv_ws, conv_bs, wfc, bfc)
    out = jax.block_until_ready(out)

    ref = textcnn_reference(token_ids, emb_matrix, conv_ws, conv_bs, wfc, bfc)
    np.testing.assert_allclose(np.asarray(out), np.asarray(ref),
                               rtol=1e-3, atol=1e-3)

    print("KERNEL_OK")
</pallas_src>

<mosaic_0001>
module attributes {stable_mosaic.version = 11 : i64} {
  func.func @textcnn_kernel(%arg0: memref<32x1xi32, #tpu.memory_space<vmem>>, %arg1: memref<50x32xbf16, #tpu.memory_space<vmem>>, %arg2: memref<32x1152xbf16, #tpu.memory_space<vmem>>, %arg3: memref<3x128xf32, #tpu.memory_space<vmem>>, %arg4: memref<384x2xf32, #tpu.memory_space<vmem>>, %arg5: memref<1x2xf32, #tpu.memory_space<vmem>>, %arg6: memref<2x2xf32, #tpu.memory_space<vmem>>) attributes {dimension_semantics = [], scalar_prefetch = 0 : i64, scratch_operands = 0 : i64, tpu.core_type = #tpu.core_type<tc>} {
    %c0 = arith.constant 0 : index
    %c0_0 = arith.constant 0 : index
    %0 = vector.load %arg0[%c0, %c0_0] : memref<32x1xi32, #tpu.memory_space<vmem>>, vector<32x1xi32>
    %1 = tpu.iota {dimensions = array<i32: 1>} : vector<32x50xi32>
    %2 = vector.broadcast %0 : vector<32x1xi32> to vector<32x50xi32>
    %3 = arith.cmpi eq, %1, %2 : vector<32x50xi32>
    %4 = arith.extui %3 : vector<32x50xi1> to vector<32x50xi32>
    %5 = arith.sitofp %4 : vector<32x50xi32> to vector<32x50xf32>
    %6 = arith.truncf %5 : vector<32x50xf32> to vector<32x50xbf16>
    %c0_1 = arith.constant 0 : index
    %c0_2 = arith.constant 0 : index
    %7 = vector.load %arg1[%c0_1, %c0_2] : memref<50x32xbf16, #tpu.memory_space<vmem>>, vector<50x32xbf16>
    %cst = arith.constant dense<0.000000e+00> : vector<32x32xf32>
    %8 = tpu.matmul %6, %7, %cst {dimension_numbers = #tpu.dot_dimension_numbers<[1], [0], [0], [1], [0, 0, 1, 1], [], []>} : vector<32x50xbf16>, vector<50x32xbf16>, vector<32x32xf32> -> vector<32x32xf32>
    %9 = arith.truncf %8 : vector<32x32xf32> to vector<32x32xbf16>
    %c0_3 = arith.constant 0 : index
    %c0_4 = arith.constant 0 : index
    %10 = vector.load %arg2[%c0_3, %c0_4] : memref<32x1152xbf16, #tpu.memory_space<vmem>>, vector<32x1152xbf16>
    %cst_5 = arith.constant dense<0.000000e+00> : vector<32x1152xf32>
    %11 = tpu.matmul %9, %10, %cst_5 {dimension_numbers = #tpu.dot_dimension_numbers<[1], [0], [0], [1], [0, 0, 1, 1], [], []>} : vector<32x32xbf16>, vector<32x1152xbf16>, vector<32x1152xf32> -> vector<32x1152xf32>
    %12 = vector.shape_cast %11 : vector<32x1152xf32> to vector<2x16x1152xf32>
    %c0_6 = arith.constant 0 : index
    %c0_7 = arith.constant 0 : index
    %13 = vector.load %arg3[%c0_6, %c0_7] : memref<3x128xf32, #tpu.memory_space<vmem>>, vector<3x128xf32>
    %c0_8 = arith.constant 0 : index
    %c0_9 = arith.constant 0 : index
    %14 = vector.load %arg4[%c0_8, %c0_9] : memref<384x2xf32, #tpu.memory_space<vmem>>, vector<384x2xf32>
    %cst_10 = arith.constant 0.000000e+00 : f32
    %15 = vector.broadcast %cst_10 : f32 to vector<2x2xf32>
    %16 = vector.extract_strided_slice %12 {offsets = [0, 0, 0], sizes = [2, 16, 128], strides = [1, 1, 1]} : vector<2x16x1152xf32> to vector<2x16x128xf32>
    %cst_11 = arith.constant dense<0xFF800000> : vector<2x128xf32>
    %17 = vector.multi_reduction <maximumf>, %16, %cst_11 [1] : vector<2x16x128xf32> to vector<2x128xf32>
    %18 = vector.extract_strided_slice %13 {offsets = [0, 0], sizes = [1, 128], strides = [1, 1]} : vector<3x128xf32> to vector<1x128xf32>
    %19 = vector.broadcast %18 : vector<1x128xf32> to vector<2x128xf32>
    %20 = arith.addf %17, %19 : vector<2x128xf32>
    %cst_12 = arith.constant 0.000000e+00 : f32
    %21 = vector.broadcast %cst_12 : f32 to vector<2x128xf32>
    %22 = arith.maximumf %20, %21 : vector<2x128xf32>
    %23 = vector.extract_strided_slice %14 {offsets = [0, 0], sizes = [128, 2], strides = [1, 1]} : vector<384x2xf32> to vector<128x2xf32>
    %cst_13 = arith.constant dense<0.000000e+00> : vector<2x2xf32>
    %24 = tpu.matmul %22, %23, %cst_13 {dimension_numbers = #tpu.dot_dimension_numbers<[1], [0], [0], [1], [0, 0, 1, 1], [], []>} : vector<2x128xf32>, vector<128x2xf32>, vector<2x2xf32> -> vector<2x2xf32>
    %25 = arith.addf %15, %24 : vector<2x2xf32>
    %26 = vector.extract_strided_slice %12 {offsets = [0, 0, 128], sizes = [2, 14, 128], strides = [1, 1, 1]} : vector<2x16x1152xf32> to vector<2x14x128xf32>
    %27 = vector.extract_strided_slice %12 {offsets = [0, 1, 256], sizes = [2, 14, 128], strides = [1, 1, 1]} : vector<2x16x1152xf32> to vector<2x14x128xf32>
    %28 = arith.addf %26, %27 : vector<2x14x128xf32>
    %29 = vector.extract_strided_slice %12 {offsets = [0, 2, 384], sizes = [2, 14, 128], strides = [1, 1, 1]} : vector<2x16x1152xf32> to vector<2x14x128xf32>
    %30 = arith.addf %28, %29 : vector<2x14x128xf32>
    %cst_14 = arith.constant dense<0xFF800000> : vector<2x128xf32>
    %31 = vector.multi_reduction <maximumf>, %30, %cst_14 [1] : vector<2x14x128xf32> to vector<2x128xf32>
    %32 = vector.extract_strided_slice %13 {offsets = [1, 0], sizes = [1, 128], strides = [1, 1]} : vector<3x128xf32> to vector<1x128xf32>
    %33 = vector.broadcast %32 : vector<1x128xf32> to vector<2x128xf32>
    %34 = arith.addf %31, %33 : vector<2x128xf32>
    %cst_15 = arith.constant 0.000000e+00 : f32
    %35 = vector.broadcast %cst_15 : f32 to vector<2x128xf32>
    %36 = arith.maximumf %34, %35 : vector<2x128xf32>
    %37 = vector.extract_strided_slice %14 {offsets = [128, 0], sizes = [128, 2], strides = [1, 1]} : vector<384x2xf32> to vector<128x2xf32>
    %cst_16 = arith.constant dense<0.000000e+00> : vector<2x2xf32>
    %38 = tpu.matmul %36, %37, %cst_16 {dimension_numbers = #tpu.dot_dimension_numbers<[1], [0], [0], [1], [0, 0, 1, 1], [], []>} : vector<2x128xf32>, vector<128x2xf32>, vector<2x2xf32> -> vector<2x2xf32>
    %39 = arith.addf %25, %38 : vector<2x2xf32>
    %40 = vector.extract_strided_slice %12 {offsets = [0, 0, 512], sizes = [2, 12, 128], strides = [1, 1, 1]} : vector<2x16x1152xf32> to vector<2x12x128xf32>
    %41 = vector.extract_strided_slice %12 {offsets = [0, 1, 640], sizes = [2, 12, 128], strides = [1, 1, 1]} : vector<2x16x1152xf32> to vector<2x12x128xf32>
    %42 = arith.addf %40, %41 : vector<2x12x128xf32>
    %43 = vector.extract_strided_slice %12 {offsets = [0, 2, 768], sizes = [2, 12, 128], strides = [1, 1, 1]} : vector<2x16x1152xf32> to vector<2x12x128xf32>
    %44 = arith.addf %42, %43 : vector<2x12x128xf32>
    %45 = vector.extract_strided_slice %12 {offsets = [0, 3, 896], sizes = [2, 12, 128], strides = [1, 1, 1]} : vector<2x16x1152xf32> to vector<2x12x128xf32>
    %46 = arith.addf %44, %45 : vector<2x12x128xf32>
    %47 = vector.extract_strided_slice %12 {offsets = [0, 4, 1024], sizes = [2, 12, 128], strides = [1, 1, 1]} : vector<2x16x1152xf32> to vector<2x12x128xf32>
    %48 = arith.addf %46, %47 : vector<2x12x128xf32>
    %cst_17 = arith.constant dense<0xFF800000> : vector<2x128xf32>
    %49 = vector.multi_reduction <maximumf>, %48, %cst_17 [1] : vector<2x12x128xf32> to vector<2x128xf32>
    %50 = vector.extract_strided_slice %13 {offsets = [2, 0], sizes = [1, 128], strides = [1, 1]} : vector<3x128xf32> to vector<1x128xf32>
    %51 = vector.broadcast %50 : vector<1x128xf32> to vector<2x128xf32>
    %52 = arith.addf %49, %51 : vector<2x128xf32>
    %cst_18 = arith.constant 0.000000e+00 : f32
    %53 = vector.broadcast %cst_18 : f32 to vector<2x128xf32>
    %54 = arith.maximumf %52, %53 : vector<2x128xf32>
    %55 = vector.extract_strided_slice %14 {offsets = [256, 0], sizes = [128, 2], strides = [1, 1]} : vector<384x2xf32> to vector<128x2xf32>
    %cst_19 = arith.constant dense<0.000000e+00> : vector<2x2xf32>
    %56 = tpu.matmul %54, %55, %cst_19 {dimension_numbers = #tpu.dot_dimension_numbers<[1], [0], [0], [1], [0, 0, 1, 1], [], []>} : vector<2x128xf32>, vector<128x2xf32>, vector<2x2xf32> -> vector<2x2xf32>
    %57 = arith.addf %39, %56 : vector<2x2xf32>
    %c0_20 = arith.constant 0 : index
    %c0_21 = arith.constant 0 : index
    %58 = vector.load %arg5[%c0_20, %c0_21] : memref<1x2xf32, #tpu.memory_space<vmem>>, vector<1x2xf32>
    %59 = vector.broadcast %58 : vector<1x2xf32> to vector<2x2xf32>
    %60 = arith.addf %57, %59 : vector<2x2xf32>
    %c0_22 = arith.constant 0 : index
    %c0_23 = arith.constant 0 : index
    %61 = vector.load %arg6[%c0_22, %c0_23] : memref<2x2xf32, #tpu.memory_space<vmem>>, vector<2x2xf32>
    tpu.vector_store %arg6[%c0_22, %c0_23], %60 {strides = array<i32>} : memref<2x2xf32, #tpu.memory_space<vmem>>, vector<2x2xf32>,
    return
  }
}

</mosaic_0001>

<bundles_post_ra>
// kernel: tpu_custom_call.1
= control target key start
LH: loop header
LB: loop body
LE: loop exit
PB: predicated region body
PF: predicated region fallthrough
CT: control target
= control target key end

     0   :  { %v1368_v2 = vmov 0   ;;  %vm92_vm0 = vcmask 1040384   ;;  %s1733_s0 = inlined_call_operand.vmem [shape: s32[32,1], index: 0, kind: input, shape index: {}]   ;;  %s1734_s1 = inlined_call_operand.vmem [shape: bf16[50,32], index: 1, kind: input, shape index: {}]   ;;  %s1735_s2 = inlined_call_operand.vmem [shape: bf16[32,1152], index: 2, kind: input, shape index: {}]   ;;  %s1736_s3 = inlined_call_operand.vmem [shape: f32[3,128], index: 3, kind: input, shape index: {}]   ;;  %s1737_s4 = inlined_call_operand.vmem [shape: f32[384,2], index: 4, kind: input, shape index: {}]   ;;  %s1738_s5 = inlined_call_operand.vmem [shape: f32[1,2], index: 5, kind: input, shape index: {}]   ;;  %s1739_s6 = inlined_call_operand.hbm [shape: f32[2,2], index: 6, kind: output, shape index: {}]  }
   0x1   :  { %v27_v0 = vld [vmem:[%s1733_s0 + $0x10] sm:$0xff]  ;;  %v25_v1 = vld [vmem:[%s1733_s0] sm:$0xff]  ;;  %1313 = vset.pattern.permute.xlu1 %v1368_v2  ;;  %1312 = vset.pattern.permute.xlu0 %v1368_v2  ;;  %v28_v3 = vld [vmem:[%s1733_s0 + $0x18] sm:$0xff] }
   0x2   :  { %v26_v4 = vld [vmem:[%s1733_s0 + $0x8] sm:$0xff]  ;;  %38 = vperm.xlu1 %1313, %v27_v0   ;;  %32 = vperm.xlu0 %1312, %v25_v1   ;;  %v1314_v5 = vld [vmem:[%s1734_s1] sm:$0xff]   ;;  %v1316_v7 = vld [vmem:[%s1734_s1 + $0x10] sm:$0xff]  }
   0x3   :  { %v1315_v6 = vld [vmem:[%s1734_s1 + $0x8] sm:$0xff]   ;;  %351 = vmatprep.mubr.bf16.mxu0 %v1368_v2  ;;  %1109 = vmatprep.subr.bf16.mxu1 %v1314_v5  ;;  %v1317_v8 = vld [vmem:[%s1734_s1 + $0x18] ss:$0 sps:$4 sm:$0x11]  }
   0x4   :  { %1110 = vmatpush3.bf16.msra.mxu1 %v1314_v5  ;;  %v1321_v9 = vld [vmem:[%s1735_s2 + $0xc] ss:$36 sps:$4 sm:$0xff]  }
   0x5   :  { %1111 = vmatprep.subr.bf16.mxu1 %v1315_v6  ;;  %v1323_v10 = vld [vmem:[%s1735_s2 + $0x8] ss:$36 sps:$4 sm:$0xff]   ;;  %319 = vmatprep.subr.bf16.mxu0 %v1321_v9 }
   0x6   :  { %41 = vperm.xlu1 %1313, %v28_v3   ;;  %35 = vperm.xlu0 %1312, %v26_v4  }
   0x8   :  { %1112 = vmatpush3.bf16.msra.mxu1 %v1315_v6 }
   0x9   :  { %1113 = vmatprep.subr.bf16.mxu1 %v1316_v7 }
   0xc   :  { %1114 = vmatpush3.bf16.msra.mxu1 %v1316_v7 }
   0xd   :  { %11 = vsyncpa [#allocation3], 0  ;;  %1306 = vmatprep.subr.msk.bf16.mxu1 %vm92_vm0, %v1317_v8  ;;  %v94_v11 = vsel %vm92_vm0, %v1317_v8, 0  ;;  %v1320_v12 = vld [vmem:[%s1735_s2 + $0x4] ss:$36 sps:$4 sm:$0xff]   ;;  %320 = vmatpush1.bf16.msra.mxu0 %v1323_v10  ;;  %v29_v13 = vlaneseq  ;;  %vm85_vm5 = vcmask 408576  }
   0xe   :  { %v1369_v19 = vmov 0.0   ;;  %v1318_v26 = vld [vmem:[%s1735_s2] ss:$36 sps:$4 sm:$0xff]   ;;  %v1326_v27 = vld [vmem:[%s1735_s2 + $0x4c] ss:$36 sps:$4 sm:$0xff]   ;;  %vm259_vm6 = vcmask 261120  }
   0xf   :  { %v30_v14 = vand.u32 127, %v29_v13  ;;  %v1327_v28 = vld [vmem:[%s1735_s2 + $0x54] ss:$36 sps:$4 sm:$0xff]   ;;  %v1324_v29 = vld [vmem:[%s1735_s2 + $0x48] ss:$36 sps:$4 sm:$0xff]   ;;  %v528_v47 = vld [vmem:[%s1737_s4] sm:$0xff] }
  0x10   :  { %1116 = vmatpush3.bf16.msra.mxu1 %v94_v11  ;;  %v1329_v30 = vld [vmem:[%s1735_s2 + $0x50] ss:$36 sps:$4 sm:$0xff]   ;;  %321 = vmatprep.subr.bf16.mxu0 %v1327_v28  ;;  %v1335_v32 = vld [vmem:[%s1735_s2 + $0x1c] ss:$36 sps:$4 sm:$0xff]   ;;  %v1341_v42 = vld [vmem:[%s1735_s2 + $0x64] ss:$36 sps:$4 sm:$0xff]  }
  0x11   :  { %266 = vmatprep.subr.bf16.mxu1 %v1320_v12  ;;  %322 = vmatpush1.bf16.msra.mxu0 %v1329_v30  ;;  %v1332_v31 = vld [vmem:[%s1735_s2 + $0x14] ss:$36 sps:$4 sm:$0xff]   ;;  %v1338_v41 = vld [vmem:[%s1735_s2 + $0x5c] ss:$36 sps:$4 sm:$0xff]   ;;  %v1343_v46 = vld [vmem:[%s1735_s2 + $0x68] ss:$36 sps:$4 sm:$0xff]  }
  0x12   :  { %425 = vmatprep.subr.bf16.mxu0 %v1335_v32  ;;  %v1330_v39 = vld [vmem:[%s1735_s2 + $0x10] ss:$36 sps:$4 sm:$0xff]   ;;  %v1333_v40 = vld [vmem:[%s1735_s2 + $0x18] ss:$36 sps:$4 sm:$0xff]   ;;  %v1339_v44 = vld [vmem:[%s1735_s2 + $0x60] ss:$36 sps:$4 sm:$0xff]  }
  0x13   :  { %v1336_v43 = vld [vmem:[%s1735_s2 + $0x58] ss:$36 sps:$4 sm:$0xff]   ;;  %v1342_v45 = vld [vmem:[%s1735_s2 + $0x20] ss:$36 sps:$4 sm:$0xff]   ;;  %v529_v48 = vld [vmem:[%s1737_s4 + $0x8] sm:$0xff]  ;;  %v1370_v50 = vmov 0.0|0.0  }
  0x14   :  { %v1259_v49 = vpack.c.bf16 %v529_v48, %v528_v47  ;;  %v530_v51 = vld [vmem:[%s1737_s4 + $0x10] sm:$0xff]  ;;  %v531_v52 = vld [vmem:[%s1737_s4 + $0x18] sm:$0xff]  ;;  %v544_v54 = vld [vmem:[%s1737_s4 + $0x80] sm:$0xff]  ;;  %vm1371_vm7 = vmmov 0   ;;  %vm602_vm8 = vcmask 1046528   ;;  %vm621_vm9 = vcmask 1045504  }
  0x15   :  { %v1262_v53 = vpack.c.bf16 %v531_v52, %v530_v51  ;;  %v545_v55 = vld [vmem:[%s1737_s4 + $0x88] sm:$0xff]  ;;  %v532_v57 = vld [vmem:[%s1737_s4 + $0x20] sm:$0xff]  ;;  %v546_v60 = vld [vmem:[%s1737_s4 + $0x90] sm:$0xff]  ;;  %vm851_vm10 = vcmask 1044480   ;;  %vm663_vm11 = vcmask 1041409   ;;  %vm870_vm12 = vcmask 1043456  }
  0x16   :  { %v1235_v56 = vpack.c.bf16 %v545_v55, %v544_v54  ;;  %v533_v58 = vld [vmem:[%s1737_s4 + $0x28] sm:$0xff]  ;;  %v547_v61 = vld [vmem:[%s1737_s4 + $0x98] sm:$0xff]  ;;  %v534_v63 = vld [vmem:[%s1737_s4 + $0x30] sm:$0xff]  ;;  %s1372_s12 = smov [#allocation2]   ;;  %vm993_vm13 = vcmask 9216  }
  0x17   :  { %v1265_v59 = vpack.c.bf16 %v533_v58, %v532_v57  ;;  %v1238_v62 = vpack.c.bf16 %v547_v61, %v546_v60  ;;  %v535_v0 = vld [vmem:[%s1737_s4 + $0x38] sm:$0xff]  ;;  %v549_v3 = vld [vmem:[%s1737_s4 + $0xa8] sm:$0xff]  ;;  %v536_v5 = vld [vmem:[%s1737_s4 + $0x40] sm:$0xff]  ;;  %s1001_s13 = sshll.u32 %s1372_s12, 4  ;;  %s1002_s13 = int_to_ptr.vmem [resolvable:$true] %s1001_s13 }
  0x18   :  { %v1268_v1 = vpack.c.bf16 %v535_v0, %v534_v63  ;;  %v537_v6 = vld [vmem:[%s1737_s4 + $0x48] sm:$0xff]  ;;  %v550_v8 = vld [vmem:[%s1737_s4 + $0xb0] sm:$0xff]  ;;  %v551_v9 = vld [vmem:[%s1737_s4 + $0xb8] sm:$0xff]  ;;  %p1349_p1 = scmp.lt.s32.totalorder %s1002_s13, %s1002_s13 }
  0x19   :  { %v1271_v7 = vpack.c.bf16 %v537_v6, %v536_v5  ;;  %v1244_v10 = vpack.c.bf16 %v551_v9, %v550_v8  ;;  %v538_v11 = vld [vmem:[%s1737_s4 + $0x50] sm:$0xff]  ;;  %v539_v12 = vld [vmem:[%s1737_s4 + $0x58] sm:$0xff]  ;;  %v556_v28 = vld [vmem:[%s1737_s4 + $0xe0] sm:$0xff] }
  0x1a   :  { %v559_v32 = vld [vmem:[%s1737_s4 + $0xf8] sm:$0xff]  ;;  %v1638_v63 = vld [vmem:[%s1736_s3] sm:$0x7] }
  0x81   :  { %v39_v15 = vpop.permute.xlu1 %38  ;;  %v33_v16 = vpop.permute.xlu0 %32 }
  0x82   :  { %vm45_vm1 = vcmp.eq.s32.totalorder %v30_v14, %v39_v15  ;;  %vm43_vm2 = vcmp.eq.s32.totalorder %v30_v14, %v33_v16  ;;  %v552_v15 = vld [vmem:[%s1737_s4 + $0xc0] sm:$0xff]  ;;  %v553_v16 = vld [vmem:[%s1737_s4 + $0xc8] sm:$0xff] }
  0x83   :  { %v1011_v20 = vsel %vm45_vm1, 1.0, %v1369_v19  ;;  %v1009_v21 = vsel %vm43_vm2, 1.0, %v1369_v19 }
  0x85   :  { %v42_v17 = vpop.permute.xlu1 %41  ;;  %v36_v18 = vpop.permute.xlu0 %35 }
  0x86   :  { %vm46_vm3 = vcmp.eq.s32.totalorder %v30_v14, %v42_v17  ;;  %vm44_vm4 = vcmp.eq.s32.totalorder %v30_v14, %v36_v18  ;;  %v1274_v14 = vpack.c.bf16 %v539_v12, %v538_v11  ;;  %v1247_v17 = vpack.c.bf16 %v553_v16, %v552_v15  ;;  %v540_v18 = vld [vmem:[%s1737_s4 + $0x60] sm:$0xff] }
  0x87   :  { %v1012_v22 = vsel %vm46_vm3, 1.0, %v1369_v19  ;;  %v1010_v23 = vsel %vm44_vm4, 1.0, %v1369_v19 }
  0x88   :  { %v56_v24 = vpack.c.bf16 %v1012_v22, %v1011_v20  ;;  %v55_v25 = vpack.c.bf16 %v1010_v23, %v1009_v21  ;;  %v541_v20 = vld [vmem:[%s1737_s4 + $0x68] sm:$0xff]  ;;  %v554_v22 = vld [vmem:[%s1737_s4 + $0xd0] sm:$0xff]  ;;  %v555_v23 = vld [vmem:[%s1737_s4 + $0xd8] sm:$0xff] }
  0x89   :  { %v1277_v21 = vpack.c.bf16 %v541_v20, %v540_v18 }
  0x8a   :  { %1117 = vmatprep.mubr.msk.bf16.mxu1 %vm85_vm5, %v55_v25  ;;  %v542_v25 = vld [vmem:[%s1737_s4 + $0x70] sm:$0xff] }
  0x8b   :  { %1118 = vmatmul.mubr.msk.bf16.vlgmr.msra.gmra.mrb[0].mxu1 %vm85_vm5, %v56_v24  ;;  %v1250_v24 = vpack.c.bf16 %v555_v23, %v554_v22 }
  0x8c   :  { %267 = vmatpush1.bf16.msra.mxu1 %v1318_v26  ;;  %298 = vmatprep.mubr.bf16.mxu1 %v1368_v2  ;;  %v543_v26 = vld [vmem:[%s1737_s4 + $0x78] sm:$0xff] }
  0x8d   :  { %268 = vmatprep.subr.bf16.mxu1 %v1326_v27  ;;  %v1280_v27 = vpack.c.bf16 %v543_v26, %v542_v25 }
  0x90   :  { %269 = vmatpush1.bf16.msra.mxu1 %v1324_v29  ;;  %v557_v29 = vld [vmem:[%s1737_s4 + $0xe8] sm:$0xff] }
  0x91   :  { %372 = vmatprep.subr.bf16.mxu1 %v1332_v31  ;;  %v1253_v30 = vpack.c.bf16 %v557_v29, %v556_v28  ;;  %v558_v31 = vld [vmem:[%s1737_s4 + $0xf0] sm:$0xff] }
 0x15e   :  { %v1119_v33 = vpop.f32.mrb[0].mxu1 }
 0x15f   :  { %v130_v34 = vpop.f32.mrb[1].mxu1 }
 0x160   :  { %v1120_v35 = vpop.f32.mrb[2].mxu1 }
 0x161   :  { %v146_v36 = vpack.c.bf16 %v1120_v35, %v1119_v33  ;;  %v133_v37 = vpop.f32.mrb[3].mxu1  ;;  %v1256_v33 = vpack.c.bf16 %v559_v32, %v558_v31 }
 0x162   :  { %v145_v38 = vpack.c.bf16 %v133_v37, %v130_v34 }
 0x164   :  { %1037 = vmatmul.mubr.msk.bf16.vlgmr.msra.gmra.mrb[4].mxu1 %vm259_vm6, %v145_v38  ;;  %1039 = vmatmul.mubr.msk.bf16.vlgmr.msra.gmra.mrb[0].mxu0 %vm259_vm6, %v145_v38 }
 0x165   :  { %308 = vmatprep.mubr.bf16.mxu1 %v1368_v2  ;;  %361 = vmatprep.mubr.bf16.mxu0 %v1368_v2 }
 0x166   :  { %373 = vmatpush1.bf16.msra.mxu1 %v1330_v39  ;;  %426 = vmatpush1.bf16.msra.mxu0 %v1333_v40 }
 0x167   :  { %374 = vmatprep.subr.bf16.mxu1 %v1338_v41  ;;  %427 = vmatprep.subr.bf16.mxu0 %v1341_v42 }
 0x16a   :  { %375 = vmatpush1.bf16.msra.mxu1 %v1336_v43  ;;  %428 = vmatpush1.bf16.msra.mxu0 %v1339_v44 }
 0x16b   :  { %1121 = vmatprep.subr.bf16.mxu1 %v1342_v45  ;;  %1234 = vmatprep.subr.bf16.mxu0 %v1370_v50 }
 0x16c   :  { %1038 = vmatmul.mubr.msk.bf16.gmra.mrb[8].mxu1 %vm259_vm6, %v146_v36  ;;  %1040 = vmatmul.mubr.msk.bf16.gmra.mrb[4].mxu0 %vm259_vm6, %v146_v36 }
 0x16d   :  { %404 = vmatprep.mubr.bf16.mxu1 %v1368_v2  ;;  %457 = vmatprep.mubr.bf16.mxu0 %v1368_v2 }
 0x174   :  { %1041 = vmatmul.mubr.msk.bf16.vlgmr.msra.gmra.mrb[12].mxu1 %vm259_vm6, %v145_v38  ;;  %1043 = vmatmul.mubr.msk.bf16.vlgmr.msra.gmra.mrb[8].mxu0 %vm259_vm6, %v145_v38 }
 0x175   :  { %414 = vmatprep.mubr.bf16.mxu1 %v1368_v2  ;;  %467 = vmatprep.mubr.bf16.mxu0 %v1368_v2  ;;  %v548_v2 = vld [vmem:[%s1737_s4 + $0xa0] sm:$0xff] }
 0x176   :  { %1122 = vmatpush3.bf16.msra.mxu1 %v1342_v45  ;;  %1236 = vmatpush3.bf16.msra.mxu0 %v1235_v56  ;;  %v1241_v4 = vpack.c.bf16 %v549_v3, %v548_v2  ;;  %v1629_v45 = vshrl.u32 %v29_v13, 7 }
 0x177   :  { %1123 = vmatprep.subr.bf16.mxu1 %v1343_v46  ;;  %1237 = vmatprep.subr.bf16.mxu0 %v1370_v50 }
 0x178   :  { %v654_v22 = vsub.s32 1, %v1629_v45 }
 0x17a   :  { %1124 = vmatpush3.bf16.msra.mxu1 %v1343_v46  ;;  %1239 = vmatpush3.bf16.msra.mxu0 %v1238_v62 }
 0x17b   :  { %1258 = vmatprep.subr.bf16.mxu1 %v1370_v50  ;;  %1240 = vmatprep.subr.bf16.mxu0 %v1370_v50 }
 0x17c   :  { %1042 = vmatmul.mubr.msk.bf16.gmra.mrb[16].mxu1 %vm259_vm6, %v146_v36  ;;  %1044 = vmatmul.mubr.msk.bf16.gmra.mrb[12].mxu0 %vm259_vm6, %v146_v36 }
 0x17d   :  { %1125 = vmatprep.mubr.msk.bf16.mxu1 %vm259_vm6, %v145_v38  ;;  %1161 = vmatprep.mubr.msk.f32.mxu0 %vm1371_vm7, %v1369_v19 }
 0x17e   :  { %1242 = vmatpush3.bf16.msra.mxu0 %v1241_v4 }
 0x17f   :  { %1243 = vmatprep.subr.bf16.mxu0 %v1370_v50 }
 0x182   :  { %1245 = vmatpush3.bf16.msra.mxu0 %v1244_v10 }
 0x183   :  { %1246 = vmatprep.subr.bf16.mxu0 %v1370_v50 }
 0x184   :  { %1126 = vmatmul.mubr.msk.bf16.vlgmr.msra.gmra.mrb[20].mxu1 %vm259_vm6, %v146_v36 }
 0x185   :  { %1260 = vmatpush3.bf16.msra.mxu1 %v1259_v49  ;;  %1196 = vmatprep.mubr.msk.f32.mxu1 %vm1371_vm7, %v1369_v19 }
 0x186   :  { %1261 = vmatprep.subr.bf16.mxu1 %v1370_v50  ;;  %1248 = vmatpush3.bf16.msra.mxu0 %v1247_v17 }
 0x187   :  { %1249 = vmatprep.subr.bf16.mxu0 %v1370_v50 }
 0x189   :  { %1263 = vmatpush3.bf16.msra.mxu1 %v1262_v53 }
 0x18a   :  { %1264 = vmatprep.subr.bf16.mxu1 %v1370_v50  ;;  %1251 = vmatpush3.bf16.msra.mxu0 %v1250_v24 }
 0x18b   :  { %1252 = vmatprep.subr.bf16.mxu0 %v1370_v50 }
 0x18d   :  { %1266 = vmatpush3.bf16.msra.mxu1 %v1265_v59  ;;  %v592_v59 = vsub.s32 0, %v1629_v45 }
 0x18e   :  { %1267 = vmatprep.subr.bf16.mxu1 %v1370_v50  ;;  %1254 = vmatpush3.bf16.msra.mxu0 %v1253_v30 }
 0x18f   :  { %1255 = vmatprep.subr.bf16.mxu0 %v1370_v50  ;;  %v593_v11 = vrot.slane %v1638_v63, %v592_v59 }
 0x191   :  { %1269 = vmatpush3.bf16.msra.mxu1 %v1268_v1 }
 0x192   :  { %1270 = vmatprep.subr.bf16.mxu1 %v1370_v50  ;;  %1257 = vmatpush3.bf16.msra.mxu0 %v1256_v33 }
 0x193   :  { %1282 = vmatprep.subr.bf16.mxu0 %v1370_v50 }
 0x195   :  { %1272 = vmatpush3.bf16.msra.mxu1 %v1271_v7 }
 0x196   :  { %1273 = vmatprep.subr.bf16.mxu1 %v1370_v50 }
 0x199   :  { %1275 = vmatpush3.bf16.msra.mxu1 %v1274_v14 }
 0x19a   :  { %1276 = vmatprep.subr.bf16.mxu1 %v1370_v50 }
 0x19d   :  { %1278 = vmatpush3.bf16.msra.mxu1 %v1277_v21 }
 0x19e   :  { %1279 = vmatprep.subr.bf16.mxu1 %v1370_v50 }
 0x1a1   :  { %1281 = vmatpush3.bf16.msra.mxu1 %v1280_v27 }
 0x237   :  { %v300_v34 = vpop.f32.mrb[4].mxu1  ;;  %v353_v35 = vpop.f32.mrb[0].mxu0 }
 0x238   :  { %v302_v36 = vpop.f32.mrb[5].mxu1  ;;  %v355_v37 = vpop.f32.mrb[1].mxu0  ;;  %v603_v40 = vrot.slane %v353_v35, 1 }
 0x239   :  { %v304_v38 = vpop.f32.mrb[6].mxu1  ;;  %v357_v39 = vpop.f32.mrb[2].mxu0  ;;  %v622_v46 = vrot.slane %v355_v37, 2 }
 0x23a   :  { %v576_v41 = vmax.f32 %v300_v34, %v304_v38  ;;  %v604_v42 = vrot.slane %v357_v39, 1  ;;  %v306_v43 = vpop.f32.mrb[7].mxu1  ;;  %v359_v44 = vpop.f32.mrb[3].mxu0  ;;  %v655_v39 = vrot.slane %v1638_v63, %v654_v22 }
 0x23b   :  { %v623_v47 = vrot.slane %v359_v44, 2 }
 0x23c   :  { %v577_v48 = vrot.slane %v576_v41, 4  ;;  %v605_v49 = vsel %vm602_vm8, %v603_v40, %v604_v42  ;;  %v614_v51 = vadd.f32 %v604_v42, %v306_v43 }
 0x23d   :  { %v613_v52 = vadd.f32 %v605_v49, %v302_v36  ;;  %v624_v53 = vsel %vm621_vm9, %v622_v46, %v623_v47 }
 0x23e   :  { %v578_v54 = vmax.f32 %v576_v41, %v577_v48  ;;  %v633_v55 = vadd.f32 %v623_v47, %v614_v51 }
 0x23f   :  { %v632_v56 = vadd.f32 %v624_v53, %v613_v52  ;;  %v310_v57 = vpop.f32.mrb[8].mxu1  ;;  %v363_v58 = vpop.f32.mrb[4].mxu0 }
 0x240   :  { %v579_v60 = vrot.slane %v578_v54, 2  ;;  %v636_v13 = vsel %vm621_vm9, %v633_v55, -inf  ;;  %v312_v61 = vpop.f32.mrb[9].mxu1  ;;  %v365_v62 = vpop.f32.mrb[5].mxu0  ;;  %v606_v4 = vrot.slane %v363_v58, 1 }
 0x241   :  { %v637_v0 = vmax.f32 %v632_v56, %v636_v13  ;;  %v314_v1 = vpop.f32.mrb[10].mxu1  ;;  %v367_v2 = vpop.f32.mrb[6].mxu0  ;;  %v625_v10 = vrot.slane %v365_v62, 2 }
 0x242   :  { %v580_v3 = vmax.f32 %v578_v54, %v579_v60  ;;  %v583_v5 = vmax.f32 %v310_v57, %v314_v1  ;;  %v607_v6 = vrot.slane %v367_v2, 1  ;;  %v316_v7 = vpop.f32.mrb[11].mxu1  ;;  %v369_v8 = vpop.f32.mrb[7].mxu0 }
 0x243   :  { %v638_v9 = vrot.slane %v637_v0, 4  ;;  %v626_v12 = vrot.slane %v369_v8, 2 }
 0x244   :  { %v581_v14 = vrot.slane %v580_v3, 1  ;;  %v584_v15 = vrot.slane %v583_v5, 4  ;;  %v608_v16 = vsel %vm602_vm8, %v606_v4, %v607_v6  ;;  %v616_v17 = vadd.f32 %v607_v6, %v316_v7 }
 0x245   :  { %v639_v18 = vmax.f32 %v637_v0, %v638_v9  ;;  %v615_v20 = vadd.f32 %v608_v16, %v312_v61  ;;  %v627_v21 = vsel %vm621_vm9, %v625_v10, %v626_v12 }
 0x246   :  { %v582_v23 = vmax.f32 %v580_v3, %v581_v14  ;;  %v585_v24 = vmax.f32 %v583_v5, %v584_v15  ;;  %v635_v25 = vadd.f32 %v626_v12, %v616_v17 }
 0x247   :  { %v640_v26 = vrot.slane %v639_v18, 2  ;;  %v634_v27 = vadd.f32 %v627_v21, %v615_v20  ;;  %v406_v28 = vpop.f32.mrb[12].mxu1  ;;  %v459_v29 = vpop.f32.mrb[8].mxu0 }
 0x248   :  { %v586_v30 = vrot.slane %v585_v24, 2  ;;  %v644_v31 = vsel %vm621_vm9, %v635_v25, -inf  ;;  %v408_v32 = vpop.f32.mrb[13].mxu1  ;;  %v461_v33 = vpop.f32.mrb[9].mxu0  ;;  %v594_v34 = vadd.f32 %v593_v11, %v582_v23  ;;  %v833_v41 = vrot.slane %v459_v29, 2 }
 0x249   :  { %v641_v35 = vmax.f32 %v639_v18, %v640_v26  ;;  %v645_v36 = vmax.f32 %v634_v27, %v644_v31  ;;  %v410_v37 = vpop.f32.mrb[14].mxu1  ;;  %v463_v38 = vpop.f32.mrb[10].mxu0  ;;  %v815_v42 = vrot.slane %v408_v32, 1  ;;  %v852_v53 = vrot.slane %v461_v33, 3 }
 0x24a   :  { %v587_v40 = vmax.f32 %v585_v24, %v586_v30  ;;  %v834_v43 = vrot.slane %v463_v38, 2  ;;  %v412_v44 = vpop.f32.mrb[15].mxu1  ;;  %v465_v46 = vpop.f32.mrb[11].mxu0  ;;  %v596_v25 = vmax.f32 %v594_v34, 0.0  ;;  %v561_v34 = vld [vmem:[%s1737_s4 + $0x108] sm:$0xff] }
 0x24b   :  { %v642_v47 = vrot.slane %v641_v35, 1  ;;  %v646_v48 = vrot.slane %v645_v36, 4  ;;  %v816_v49 = vrot.slane %v412_v44, 1  ;;  %v853_v51 = vrot.slane %v465_v46, 3 }
 0x24c   :  { %v588_v52 = vrot.slane %v587_v40, 1  ;;  %v835_v54 = vsel %vm621_vm9, %v833_v41, %v834_v43 }
 0x24d   :  { %v643_v55 = vmax.f32 %v641_v35, %v642_v47  ;;  %v647_v56 = vmax.f32 %v645_v36, %v646_v48  ;;  %v817_v57 = vsel %vm602_vm8, %v815_v42, %v816_v49  ;;  %v826_v58 = vadd.f32 %v816_v49, %v410_v37  ;;  %v560_v37 = vld [vmem:[%s1737_s4 + $0x100] sm:$0xff] }
 0x24e   :  { %v589_v59 = vmax.f32 %v587_v40, %v588_v52  ;;  %v825_v60 = vadd.f32 %v817_v57, %v406_v28  ;;  %v854_v13 = vsel %vm851_vm10, %v852_v53, %v853_v51  ;;  %v1283_v49 = vpack.c.bf16 %v561_v34, %v560_v37  ;;  %v563_v57 = vld [vmem:[%s1737_s4 + $0x118] sm:$0xff] }
 0x24f   :  { %v648_v61 = vrot.slane %v647_v56, 2  ;;  %v844_v62 = vadd.f32 %v834_v43, %v826_v58  ;;  %v416_v0 = vpop.f32.mrb[16].mxu1  ;;  %v469_v1 = vpop.f32.mrb[12].mxu0  ;;  %v656_v2 = vadd.f32 %v655_v39, %v643_v55 }
 0x250   :  { %v595_v3 = vadd.f32 %v593_v11, %v589_v59  ;;  %v843_v4 = vadd.f32 %v835_v54, %v825_v60  ;;  %v418_v5 = vpop.f32.mrb[17].mxu1  ;;  %v471_v6 = vpop.f32.mrb[13].mxu0  ;;  %v836_v9 = vrot.slane %v469_v1, 2 }
 0x251   :  { %v649_v7 = vmax.f32 %v647_v56, %v648_v61  ;;  %v863_v8 = vadd.f32 %v853_v51, %v844_v62  ;;  %v420_v10 = vpop.f32.mrb[18].mxu1  ;;  %v473_v12 = vpop.f32.mrb[14].mxu0  ;;  %v818_v15 = vrot.slane %v418_v5, 1  ;;  %v855_v22 = vrot.slane %v471_v6, 3  ;;  %v562_v56 = vld [vmem:[%s1737_s4 + $0x110] sm:$0xff]  ;;  %v565_v5 = vld [vmem:[%s1737_s4 + $0x128] sm:$0xff] }
 0x252   :  { %v862_v14 = vadd.f32 %v854_v13, %v843_v4  ;;  %v837_v16 = vrot.slane %v473_v12, 2  ;;  %v422_v17 = vpop.f32.mrb[19].mxu1  ;;  %v475_v18 = vpop.f32.mrb[15].mxu0  ;;  %v597_v20 = vmax.f32 %v595_v3, 0.0  ;;  %v658_v52 = vmax.f32 %v656_v2, 0.0  ;;  %v564_v4 = vld [vmem:[%s1737_s4 + $0x120] sm:$0xff] }
 0x253   :  { %v650_v21 = vrot.slane %v649_v7, 1  ;;  %v819_v23 = vrot.slane %v422_v17, 1  ;;  %v856_v24 = vrot.slane %v475_v18, 3  ;;  %v1286_v2 = vpack.c.bf16 %v563_v57, %v562_v56  ;;  %v567_v12 = vld [vmem:[%s1737_s4 + $0x138] sm:$0xff] }
 0x254   :  { %v838_v11 = vsel %vm621_vm9, %v836_v9, %v837_v16  ;;  %v738_v26 = vrot.slane %v597_v20, 7  ;;  %v1289_v9 = vpack.c.bf16 %v565_v5, %v564_v4 }
 0x255   :  { %v651_v27 = vmax.f32 %v649_v7, %v650_v21  ;;  %v820_v28 = vsel %vm602_vm8, %v818_v15, %v819_v23  ;;  %v828_v29 = vadd.f32 %v819_v23, %v420_v10  ;;  %v857_v30 = vsel %vm851_vm10, %v855_v22, %v856_v24  ;;  %v568_v21 = vld [vmem:[%s1737_s4 + $0x140] sm:$0xff]  ;;  %v569_v22 = vld [vmem:[%s1737_s4 + $0x148] sm:$0xff] }
 0x256   :  { %v827_v31 = vadd.f32 %v820_v28, %v416_v0  ;;  %v739_v32 = vsel %vm663_vm11, %v738_v26, %v596_v25  ;;  %v903_v15 = vsub.s32 2, %v1629_v45  ;;  %v1295_v45 = vpack.c.bf16 %v569_v22, %v568_v21  ;;  %v570_v26 = vld [vmem:[%s1737_s4 + $0x150] sm:$0xff] }
 0x257   :  { %v846_v33 = vadd.f32 %v837_v16, %v828_v29  ;;  %v1127_v35 = vpop.f32.mrb[20].mxu1  ;;  %1197 = vmatmul.mubr.f32.vlgmr.msra.gmra.mrb[24].mxu1 %v739_v32  ;;  %v657_v36 = vadd.f32 %v655_v39, %v651_v27  ;;  %v571_v27 = vld [vmem:[%s1737_s4 + $0x158] sm:$0xff]  ;;  %v572_v32 = vld [vmem:[%s1737_s4 + $0x160] sm:$0xff] }
 0x258   :  { %v845_v38 = vadd.f32 %v838_v11, %v827_v31  ;;  %v512_v40 = vpop.f32.mrb[21].mxu1  ;;  %v874_v46 = vrot.slane %v1127_v35, 4  ;;  %v1298_v31 = vpack.c.bf16 %v571_v27, %v570_v26 }
 0x259   :  { %v865_v41 = vadd.f32 %v856_v24, %v846_v33  ;;  %v1128_v42 = vpop.f32.mrb[22].mxu1  ;;  %v659_v43 = vmax.f32 %v657_v36, 0.0  ;;  %v871_v39 = vrot.slane %v512_v40, 4  ;;  %v904_v24 = vrot.slane %v1638_v63, %v903_v15  ;;  %v573_v33 = vld [vmem:[%s1737_s4 + $0x168] sm:$0xff]  ;;  %v575_v40 = vld [vmem:[%s1737_s4 + $0x178] sm:$0xff] }
 0x25a   :  { %v864_v44 = vadd.f32 %v857_v30, %v845_v38  ;;  %v875_v47 = vrot.slane %v1128_v42, 4  ;;  %v515_v48 = vpop.f32.mrb[23].mxu1  ;;  %v1301_v37 = vpack.c.bf16 %v573_v33, %v572_v32  ;;  %v574_v38 = vld [vmem:[%s1737_s4 + $0x170] sm:$0xff] }
 0x25b   :  { %v872_v51 = vrot.slane %v515_v48, 4  ;;  %v662_v53 = vrot.slane %v659_v43, 7 }
 0x25c   :  { %v876_v54 = vsel %vm870_vm12, %v874_v46, %v875_v47  ;;  %v884_v55 = vadd.f32 %v875_v47, %v865_v41  ;;  %v1304_v41 = vpack.c.bf16 %v575_v40, %v574_v38 }
 0x25d   :  { %v883_v58 = vadd.f32 %v876_v54, %v864_v44  ;;  %v873_v59 = vsel %vm870_vm12, %v871_v39, %v872_v51  ;;  %v882_v60 = vadd.f32 %v872_v51, %v863_v8  ;;  %v664_v13 = vsel %vm663_vm11, %v662_v53, %v658_v52 }
 0x25e   :  { %v893_v61 = vsel %vm870_vm12, %v884_v55, -inf  ;;  %v881_v62 = vadd.f32 %v873_v59, %v862_v14  ;;  %1162 = vmatmul.mubr.f32.vlgmr.msra.gmra.mrb[16].mxu0 %v664_v13 }
 0x25f   :  { %v894_v0 = vmax.f32 %v883_v58, %v893_v61  ;;  %v885_v1 = vsel %vm870_vm12, %v882_v60, -inf  ;;  %1284 = vmatpush3.bf16.msra.mxu0 %v1283_v49  ;;  %1231 = vmatprep.mubr.msk.f32.mxu0 %vm1371_vm7, %v1369_v19  ;;  %v566_v19 = vld [vmem:[%s1737_s4 + $0x130] sm:$0xff]  ;;  %v1047_v49 = vld [vmem:[%s1738_s5] ss:$0 sm:$0xff]  ;;  %s1344_s4 = scalar_lea.vmem %s1002_s13, 32 }
 0x260   :  { %v886_v3 = vmax.f32 %v881_v62, %v885_v1  ;;  %1285 = vmatprep.subr.bf16.mxu0 %v1370_v50  ;;  %v1292_v18 = vpack.c.bf16 %v567_v12, %v566_v19  ;;  %p1345_p0 = scmp.ne.s32.totalorder %s1002_s13, %s1344_s4  ;;  %p1350_p2 = scmp.lt.s32.totalorder %s1344_s4, %s1344_s4 }
 0x261   :  { %v895_v6 = vrot.slane %v894_v0, 4 }
 0x262   :  { %v887_v7 = vrot.slane %v886_v3, 4  ;;  %p1351_p3 = por %p1350_p2, %p1349_p1 }
 0x263   :  { %v896_v8 = vmax.f32 %v894_v0, %v895_v6  ;;  %1287 = vmatpush3.bf16.msra.mxu0 %v1286_v2 }
 0x264   :  { %v888_v10 = vmax.f32 %v886_v3, %v887_v7  ;;  %1288 = vmatprep.subr.bf16.mxu0 %v1370_v50  ;;  %p1352_p4 = pnand %p1351_p3, %p1345_p0 }
 0x265   :  { %v897_v14 = vrot.slane %v896_v8, 2 }
 0x266   :  { %v889_v16 = vrot.slane %v888_v10, 2 }
 0x267   :  { %v898_v17 = vmax.f32 %v896_v8, %v897_v14  ;;  %1290 = vmatpush3.bf16.msra.mxu0 %v1289_v9 }
 0x268   :  { %v890_v20 = vmax.f32 %v888_v10, %v889_v16  ;;  %1291 = vmatprep.subr.bf16.mxu0 %v1370_v50 }
 0x269   :  { %v899_v23 = vrot.slane %v898_v17, 1 }
 0x26a   :  { %v891_v11 = vrot.slane %v890_v20, 1 }
 0x26b   :  { %1293 = vmatpush3.bf16.msra.mxu0 %v1292_v18  ;;  %v900_v25 = vmax.f32 %v898_v17, %v899_v23 }
 0x26c   :  { %1294 = vmatprep.subr.bf16.mxu0 %v1370_v50  ;;  %v892_v28 = vmax.f32 %v890_v20, %v891_v11 }
 0x26d   :  { %v906_v29 = vadd.f32 %v904_v24, %v900_v25 }
 0x26e   :  { %v905_v30 = vadd.f32 %v904_v24, %v892_v28 }
 0x26f   :  { %1296 = vmatpush3.bf16.msra.mxu0 %v1295_v45  ;;  %v908_v63 = vmax.f32 %v906_v29, 0.0 }
 0x270   :  { %1297 = vmatprep.subr.bf16.mxu0 %v1370_v50  ;;  %v907_v35 = vmax.f32 %v905_v30, 0.0 }
 0x271   :  { %v911_v36 = vrot.slane %v908_v63, 7 }
 0x273   :  { %1299 = vmatpush3.bf16.msra.mxu0 %v1298_v31  ;;  %v912_v34 = vsel %vm663_vm11, %v911_v36, %v907_v35 }
 0x274   :  { %1300 = vmatprep.subr.bf16.mxu0 %v1370_v50 }
 0x277   :  { %1302 = vmatpush3.bf16.msra.mxu0 %v1301_v37 }
 0x278   :  { %1303 = vmatprep.subr.bf16.mxu0 %v1370_v50 }
 0x27b   :  { %1305 = vmatpush3.bf16.msra.mxu0 %v1304_v41 }
 0x27e   :  { %1232 = vmatmul.mubr.f32.vlgmr.msra.gmra.mrb[18].mxu0 %v912_v34 }
 0x32a   :  { %v807_v42 = vpop.f32.mrb[24].mxu1 }
 0x32b   :  { %v1198_v43 = vpop.f32.mrb[25].mxu1 }
 0x331   :  { %v732_v44 = vpop.f32.mrb[16].mxu0 }
 0x332   :  { %v808_v46 = vadd.f32 %v807_v42, %v732_v44  ;;  %v1163_v47 = vpop.f32.mrb[17].mxu0 }
 0x351   :  { %v980_v48 = vpop.f32.mrb[18].mxu0 }
 0x352   :  { %v984_v39 = vadd.f32 %v980_v48, %v808_v46  ;;  %v1233_v51 = vpop.f32.mrb[19].mxu0 }
 0x354   :  { %v992_v52 = vadd.f32 %v1047_v49, %v984_v39 }
 0x356   :  { %994 = vst.msk [vmem:[#allocation2] sm:$0x3] %vm993_vm13, %v992_v52 }
 0x357   :  { %1355 = shalt.err (!%p1352_p4)
}
 0x358   :  { %s1356_s16 = scalar_lea.hbm %s1739_s6, 32 }
 0x359   :  { %p1357_p5 = scmp.ne.s32.totalorder %s1739_s6, %s1356_s16  ;;  %p1360_p6 = scmp.lt.u32.totalorder %s1356_s16, %s1739_s6 }
 0x35b   :  { %p1362_p7 = pnand %p1360_p6, %p1357_p5 }
 0x35d   :  { %1365 = shalt.err (!%p1362_p7)
}
 0x35e   :  { %1004 = dma.vmem_to_hbm [thread:$0]  %s1002_s13, 32, %s1739_s6, [#allocation3]  }
 0x35f   :  { %1366 = dma.done.wait [#allocation3], 32  }
 0x360   :  { %1367 = vsyncadd [#allocation3], 4294967264 }
 0x361   :  { %1008 = vsyncpa [#allocation3], 1 }

</bundles_post_ra>
